<compile_context>
chip_gen: v6e
topology: v6e:2x2x1
jax: 0.10.0
libtpu: 0.0.40
codegen_flags: <defaults>
</compile_context>

<pallas_src>
import functools

import jax
import jax.numpy as jnp
from jax import lax
from jax.experimental import pallas as pl
from jax.experimental.pallas import tpu as pltpu


# ----------------------------- in-kernel math helpers -----------------------------

_INV_SQRT2 = 0.7071067811865476


def _gelu(x):
    # Exact erf-based GELU == torch.nn.functional.gelu default.
    return 0.5 * x * (1.0 + lax.erf(x * _INV_SQRT2))


def _layer_norm(x, gamma, beta, eps=1e-5):
    mu = jnp.mean(x, axis=-1, keepdims=True)
    var = jnp.mean((x - mu) ** 2, axis=-1, keepdims=True)   # biased var, as nn.LayerNorm
    return (x - mu) * lax.rsqrt(var + eps) * gamma + beta


def _dot(a, b):
    return jnp.dot(a, b, preferred_element_type=jnp.float32)


# ----------------------------------- kernel ----------------------------------------

def mlp_kernel(x_ref, w_in_ref, w_hid_ref, w_out_ref, vecs_ref, b_out_ref, out_ref,
               *, num_hidden):
    """One row-tile of the fused MLP.

    vecs_ref row layout (all [H]-wide, packed into one slab):
        row 0                      : b_in
        rows 1 .. num_hidden       : hidden-layer biases
        next (num_hidden+1) rows   : LayerNorm gammas
        next (num_hidden+1) rows   : LayerNorm betas
    """
    num_ln = num_hidden + 1          # == num_layers - 1
    ln_g0 = 1 + num_hidden
    ln_b0 = ln_g0 + num_ln

    def vec(r):                      # static row index -> [1, H] (broadcasts over rows)
        return vecs_ref[pl.ds(r, 1), :]

    # first Linear: [TR, DIN] @ [DIN, H] + b_in
    h = _dot(x_ref[...], w_in_ref[...]) + vec(0)

    # (num_layers - 1) x [GELU -> LayerNorm -> dropout -> (next hidden Linear)]
    for i in range(num_ln):
        h = _gelu(h)
        h = _layer_norm(h, vec(ln_g0 + i), vec(ln_b0 + i))
        # F.dropout(p=dropout): dropout == 0.0 here -> identity.
        # TODO(synk): training-mode dropout (p > 0) would use pltpu.prng_seed +
        # pltpu.stateful_bernoulli inside the kernel; eval-mode / p=0 is identity.
        if i < num_hidden:
            h = _dot(h, w_hid_ref[i]) + vec(1 + i)

    # final Linear, zero-padded to a lane-dense (128-multiple) output width so the
    # store is a full unmasked vst (padded columns are exactly zero).
    out_ref[...] = _dot(h, w_out_ref[...]) + b_out_ref[...]


# ------------------------------- glue / wrapper -------------------------------------

def _pick_row_tile(n):
    # 256-row tiles fill the 256-wide MXU on v6e/v7x; fall back to the largest exact
    # divisor so blocks tile the row axis without remainder handling.
    for t in (512, 256, 128, 64, 32, 16, 8):
        if n % t == 0:
            return t
    return n


def mlp_forward(x, params, dropout=0.0):
    assert dropout == 0.0, "deterministic script: dropout fixed to 0.0 (eval / p=0)"
    # TODO(synk): the num_layers == 1 degenerate case (single Linear, no GELU/LN) is not
    # wired here; this wrapper covers num_layers >= 2 as in the example below.

    n, din = x.shape
    hidden = params["w_in"].shape[0]
    num_hidden = params["w_hid"].shape[0]        # num_layers - 2
    num_ln = num_hidden + 1
    c = params["w_out"].shape[0]
    cpad = max(128, ((c + 127) // 128) * 128)    # lane-dense output width

    # pre-transpose (torch stores [out, in]) so the kernel does h @ W^T directly
    w_in_t = params["w_in"].T.astype(jnp.float32)                          # [DIN, H]
    if num_hidden > 0:
        w_hid_t = jnp.transpose(params["w_hid"], (0, 2, 1)).astype(jnp.float32)
    else:
        w_hid_t = jnp.zeros((1, hidden, hidden), jnp.float32)              # dummy, unused
    w_out_t = jnp.zeros((hidden, cpad), jnp.float32).at[:, :c].set(params["w_out"].T)
    b_out_p = jnp.zeros((1, cpad), jnp.float32).at[:, :c].set(params["b_out"])

    # pack every [H]-wide vector parameter into ONE slab -> one DMA instead of ~10
    vecs = jnp.concatenate(
        [params["b_in"][None, :],
         params["b_hid"].reshape(num_hidden, hidden),
         params["ln_g"],
         params["ln_b"]], axis=0).astype(jnp.float32)      # [1+(L-2)+2(L-1), H]

    tr = _pick_row_tile(n)
    grid = (n // tr,)

    def full_spec(shape):
        nd = len(shape)
        return pl.BlockSpec(shape, lambda i, _nd=nd: (0,) * _nd)

    cost = pl.CostEstimate(
        flops=2 * n * (din * hidden + num_hidden * hidden * hidden + hidden * cpad),
        transcendentals=n * hidden * num_ln,                 # one erf per element per GELU
        bytes_accessed=4 * (x.size + w_in_t.size + w_hid_t.size + w_out_t.size
                            + vecs.size + b_out_p.size + n * cpad),
    )

    kernel = functools.partial(mlp_kernel, num_hidden=num_hidden)
    out_pad = pl.pallas_call(
        kernel,
        out_shape=jax.ShapeDtypeStruct((n, cpad), jnp.float32),
        grid=grid,
        in_specs=[
            pl.BlockSpec((tr, din), lambda i: (i, 0)),       # x row tile
            full_spec((din, hidden)),                        # W_in^T
            full_spec((max(num_hidden, 1), hidden, hidden)), # stacked hidden W^T
            full_spec((hidden, cpad)),                       # W_out^T (lane-padded)
            full_spec(vecs.shape),                           # packed bias / LN slab
            full_spec((1, cpad)),                            # b_out (lane-padded)
        ],
        out_specs=pl.BlockSpec((tr, cpad), lambda i: (i, 0)),
        compiler_params=pltpu.CompilerParams(
            dimension_semantics=("parallel",)),              # shards rows over v7x's 2 TCs
        cost_estimate=cost,
    )(x.astype(jnp.float32), w_in_t, w_hid_t, w_out_t, vecs, b_out_p)

    return out_pad[:, :c]                                    # slice off zero padding


# ------------------------------ reference & params ----------------------------------

def mlp_reference(x, params):
    """Pure-JAX reference with identical math (for validation)."""
    h = x @ params["w_in"].T + params["b_in"]
    num_hidden = params["w_hid"].shape[0]
    for i in range(num_hidden + 1):
        h = _gelu(h)
        h = _layer_norm(h, params["ln_g"][i], params["ln_b"][i])
        if i < num_hidden:
            h = h @ params["w_hid"][i].T + params["b_hid"][i]
    return h @ params["w_out"].T + params["b_out"]


def init_params(key, num_features, hidden, num_classes, num_layers):
    assert num_layers >= 2
    m = num_layers - 2
    ks = jax.random.split(key, 6)
    s = 0.1
    return {
        "w_in": s * jax.random.normal(ks[0], (hidden, num_features), jnp.float32),
        "b_in": s * jax.random.normal(ks[1], (hidden,), jnp.float32),
        "w_hid": s * jax.random.normal(ks[2], (m, hidden, hidden), jnp.float32),
        "b_hid": s * jax.random.normal(ks[3], (m, hidden), jnp.float32),
        "ln_g": jnp.ones((num_layers - 1, hidden), jnp.float32),
        "ln_b": jnp.zeros((num_layers - 1, hidden), jnp.float32),
        "w_out": s * jax.random.normal(ks[4], (num_classes, hidden), jnp.float32),
        "b_out": s * jax.random.normal(ks[5], (num_classes,), jnp.float32),
    }


if __name__ == "__main__":
    N, DIN, H, C = 64, 16, 32, 8        # rows, in_channels, hidden_channels, out_channels
    NUM_LAYERS = 3                       # Linear(16->32), Linear(32->32), Linear(32->8)
    DROPOUT = 0.0                        # deterministic (p=0 -> dropout is identity)

    key = jax.random.PRNGKey(0)
    kx, kp = jax.random.split(key)
    x = jax.random.normal(kx, (N, DIN), jnp.float32)
    params = init_params(kp, DIN, H, C, NUM_LAYERS)

    out = mlp_forward(x, params, dropout=DROPOUT)
    jax.block_until_ready(out)

    assert out.shape == (N, C)
    assert bool(jnp.all(jnp.isfinite(out)))
    ref = mlp_reference(x, params)
    assert bool(jnp.allclose(out, ref, atol=1e-3, rtol=1e-3)), "mismatch vs pure-JAX reference"
    print("KERNEL_OK")
</pallas_src>

<mosaic_0001>
module attributes {stable_mosaic.version = 11 : i64} {
  func.func @mlp_kernel(%arg0: i32, %arg1: memref<64x16xf32, #tpu.memory_space<vmem>>, %arg2: memref<16x32xf32, #tpu.memory_space<vmem>>, %arg3: memref<1x32x32xf32, #tpu.memory_space<vmem>>, %arg4: memref<32x128xf32, #tpu.memory_space<vmem>>, %arg5: memref<6x32xf32, #tpu.memory_space<vmem>>, %arg6: memref<1x128xf32, #tpu.memory_space<vmem>>, %arg7: memref<64x128xf32, #tpu.memory_space<vmem>>) attributes {dimension_semantics = [#tpu.dimension_semantics<parallel>], iteration_bounds = array<i64: 1>, scalar_prefetch = 0 : i64, scratch_operands = 0 : i64, tpu.core_type = #tpu.core_type<tc>, window_params = [{transform_indices = @transform_0, window_bounds = array<i64: 64, 16>}, {pipeline_mode = #tpu.pipeline_mode<synchronous>, transform_indices = @transform_1, window_bounds = array<i64: 16, 32>}, {pipeline_mode = #tpu.pipeline_mode<synchronous>, transform_indices = @transform_2, window_bounds = array<i64: 1, 32, 32>}, {pipeline_mode = #tpu.pipeline_mode<synchronous>, transform_indices = @transform_3, window_bounds = array<i64: 32, 128>}, {pipeline_mode = #tpu.pipeline_mode<synchronous>, transform_indices = @transform_4, window_bounds = array<i64: 6, 32>}, {pipeline_mode = #tpu.pipeline_mode<synchronous>, transform_indices = @transform_5, window_bounds = array<i64: 1, 128>}, {transform_indices = @transform_6, window_bounds = array<i64: 64, 128>}]} {
    %c0 = arith.constant 0 : index
    %c0_0 = arith.constant 0 : index
    %0 = vector.load %arg1[%c0, %c0_0] : memref<64x16xf32, #tpu.memory_space<vmem>>, vector<64x16xf32>
    %c0_1 = arith.constant 0 : index
    %c0_2 = arith.constant 0 : index
    %1 = vector.load %arg2[%c0_1, %c0_2] : memref<16x32xf32, #tpu.memory_space<vmem>>, vector<16x32xf32>
    %cst = arith.constant dense<0.000000e+00> : vector<64x32xf32>
    %2 = tpu.matmul %0, %1, %cst {dimension_numbers = #tpu.dot_dimension_numbers<[1], [0], [0], [1], [0, 0, 1, 1], [], []>} : vector<64x16xf32>, vector<16x32xf32>, vector<64x32xf32> -> vector<64x32xf32>
    %c0_3 = arith.constant 0 : index
    %c0_4 = arith.constant 0 : index
    %3 = vector.load %arg5[%c0_3, %c0_4] : memref<6x32xf32, #tpu.memory_space<vmem>>, vector<1x32xf32>
    %4 = vector.broadcast %3 : vector<1x32xf32> to vector<64x32xf32>
    %5 = arith.addf %2, %4 : vector<64x32xf32>
    %cst_5 = arith.constant 5.000000e-01 : f32
    %6 = vector.broadcast %cst_5 : f32 to vector<64x32xf32>
    %7 = arith.mulf %6, %5 : vector<64x32xf32>
    %cst_6 = arith.constant 0.707106769 : f32
    %8 = vector.broadcast %cst_6 : f32 to vector<64x32xf32>
    %9 = arith.mulf %5, %8 : vector<64x32xf32>
    %10 = math.erf %9 : vector<64x32xf32>
    %cst_7 = arith.constant 1.000000e+00 : f32
    %11 = vector.broadcast %cst_7 : f32 to vector<64x32xf32>
    %12 = arith.addf %11, %10 : vector<64x32xf32>
    %13 = arith.mulf %7, %12 : vector<64x32xf32>
    %c2 = arith.constant 2 : index
    %c0_8 = arith.constant 0 : index
    %14 = vector.load %arg5[%c2, %c0_8] : memref<6x32xf32, #tpu.memory_space<vmem>>, vector<1x32xf32>
    %c4 = arith.constant 4 : index
    %c0_9 = arith.constant 0 : index
    %15 = vector.load %arg5[%c4, %c0_9] : memref<6x32xf32, #tpu.memory_space<vmem>>, vector<1x32xf32>
    %cst_10 = arith.constant dense<0.000000e+00> : vector<64xf32>
    %16 = vector.multi_reduction <add>, %13, %cst_10 [1] : vector<64x32xf32> to vector<64xf32>
    %17 = vector.shape_cast %16 : vector<64xf32> to vector<64x1xf32>
    %cst_11 = arith.constant 3.200000e+01 : f32
    %18 = vector.broadcast %cst_11 : f32 to vector<64x1xf32>
    %19 = arith.divf %17, %18 : vector<64x1xf32>
    %20 = vector.broadcast %19 : vector<64x1xf32> to vector<64x32xf32>
    %21 = arith.subf %13, %20 : vector<64x32xf32>
    %22 = arith.mulf %21, %21 : vector<64x32xf32>
    %cst_12 = arith.constant dense<0.000000e+00> : vector<64xf32>
    %23 = vector.multi_reduction <add>, %22, %cst_12 [1] : vector<64x32xf32> to vector<64xf32>
    %24 = vector.shape_cast %23 : vector<64xf32> to vector<64x1xf32>
    %cst_13 = arith.constant 3.200000e+01 : f32
    %25 = vector.broadcast %cst_13 : f32 to vector<64x1xf32>
    %26 = arith.divf %24, %25 : vector<64x1xf32>
    %27 = vector.broadcast %19 : vector<64x1xf32> to vector<64x32xf32>
    %28 = arith.subf %13, %27 : vector<64x32xf32>
    %cst_14 = arith.constant 9.99999974E-6 : f32
    %29 = vector.broadcast %cst_14 : f32 to vector<64x1xf32>
    %30 = arith.addf %26, %29 : vector<64x1xf32>
    %31 = math.rsqrt %30 : vector<64x1xf32>
    %32 = vector.broadcast %31 : vector<64x1xf32> to vector<64x32xf32>
    %33 = arith.mulf %28, %32 : vector<64x32xf32>
    %34 = vector.broadcast %14 : vector<1x32xf32> to vector<64x32xf32>
    %35 = arith.mulf %33, %34 : vector<64x32xf32>
    %36 = vector.broadcast %15 : vector<1x32xf32> to vector<64x32xf32>
    %37 = arith.addf %35, %36 : vector<64x32xf32>
    %c0_15 = arith.constant 0 : index
    %c0_16 = arith.constant 0 : index
    %c0_17 = arith.constant 0 : index
    %38 = vector.load %arg3[%c0_15, %c0_16, %c0_17] : memref<1x32x32xf32, #tpu.memory_space<vmem>>, vector<1x32x32xf32>
    %39 = vector.shape_cast %38 : vector<1x32x32xf32> to vector<32x32xf32>
    %cst_18 = arith.constant dense<0.000000e+00> : vector<64x32xf32>
    %40 = tpu.matmul %37, %39, %cst_18 {dimension_numbers = #tpu.dot_dimension_numbers<[1], [0], [0], [1], [0, 0, 1, 1], [], []>} : vector<64x32xf32>, vector<32x32xf32>, vector<64x32xf32> -> vector<64x32xf32>
    %c1 = arith.constant 1 : index
    %c0_19 = arith.constant 0 : index
    %41 = vector.load %arg5[%c1, %c0_19] : memref<6x32xf32, #tpu.memory_space<vmem>>, vector<1x32xf32>
    %42 = vector.broadcast %41 : vector<1x32xf32> to vector<64x32xf32>
    %43 = arith.addf %40, %42 : vector<64x32xf32>
    %cst_20 = arith.constant 5.000000e-01 : f32
    %44 = vector.broadcast %cst_20 : f32 to vector<64x32xf32>
    %45 = arith.mulf %44, %43 : vector<64x32xf32>
    %cst_21 = arith.constant 0.707106769 : f32
    %46 = vector.broadcast %cst_21 : f32 to vector<64x32xf32>
    %47 = arith.mulf %43, %46 : vector<64x32xf32>
    %48 = math.erf %47 : vector<64x32xf32>
    %cst_22 = arith.constant 1.000000e+00 : f32
    %49 = vector.broadcast %cst_22 : f32 to vector<64x32xf32>
    %50 = arith.addf %49, %48 : vector<64x32xf32>
    %51 = arith.mulf %45, %50 : vector<64x32xf32>
    %c3 = arith.constant 3 : index
    %c0_23 = arith.constant 0 : index
    %52 = vector.load %arg5[%c3, %c0_23] : memref<6x32xf32, #tpu.memory_space<vmem>>, vector<1x32xf32>
    %c5 = arith.constant 5 : index
    %c0_24 = arith.constant 0 : index
    %53 = vector.load %arg5[%c5, %c0_24] : memref<6x32xf32, #tpu.memory_space<vmem>>, vector<1x32xf32>
    %cst_25 = arith.constant dense<0.000000e+00> : vector<64xf32>
    %54 = vector.multi_reduction <add>, %51, %cst_25 [1] : vector<64x32xf32> to vector<64xf32>
    %55 = vector.shape_cast %54 : vector<64xf32> to vector<64x1xf32>
    %cst_26 = arith.constant 3.200000e+01 : f32
    %56 = vector.broadcast %cst_26 : f32 to vector<64x1xf32>
    %57 = arith.divf %55, %56 : vector<64x1xf32>
    %58 = vector.broadcast %57 : vector<64x1xf32> to vector<64x32xf32>
    %59 = arith.subf %51, %58 : vector<64x32xf32>
    %60 = arith.mulf %59, %59 : vector<64x32xf32>
    %cst_27 = arith.constant dense<0.000000e+00> : vector<64xf32>
    %61 = vector.multi_reduction <add>, %60, %cst_27 [1] : vector<64x32xf32> to vector<64xf32>
    %62 = vector.shape_cast %61 : vector<64xf32> to vector<64x1xf32>
    %cst_28 = arith.constant 3.200000e+01 : f32
    %63 = vector.broadcast %cst_28 : f32 to vector<64x1xf32>
    %64 = arith.divf %62, %63 : vector<64x1xf32>
    %65 = vector.broadcast %57 : vector<64x1xf32> to vector<64x32xf32>
    %66 = arith.subf %51, %65 : vector<64x32xf32>
    %cst_29 = arith.constant 9.99999974E-6 : f32
    %67 = vector.broadcast %cst_29 : f32 to vector<64x1xf32>
    %68 = arith.addf %64, %67 : vector<64x1xf32>
    %69 = math.rsqrt %68 : vector<64x1xf32>
    %70 = vector.broadcast %69 : vector<64x1xf32> to vector<64x32xf32>
    %71 = arith.mulf %66, %70 : vector<64x32xf32>
    %72 = vector.broadcast %52 : vector<1x32xf32> to vector<64x32xf32>
    %73 = arith.mulf %71, %72 : vector<64x32xf32>
    %74 = vector.broadcast %53 : vector<1x32xf32> to vector<64x32xf32>
    %75 = arith.addf %73, %74 : vector<64x32xf32>
    %c0_30 = arith.constant 0 : index
    %c0_31 = arith.constant 0 : index
    %76 = vector.load %arg4[%c0_30, %c0_31] : memref<32x128xf32, #tpu.memory_space<vmem>>, vector<32x128xf32>
    %cst_32 = arith.constant dense<0.000000e+00> : vector<64x128xf32>
    %77 = tpu.matmul %75, %76, %cst_32 {dimension_numbers = #tpu.dot_dimension_numbers<[1], [0], [0], [1], [0, 0, 1, 1], [], []>} : vector<64x32xf32>, vector<32x128xf32>, vector<64x128xf32> -> vector<64x128xf32>
    %c0_33 = arith.constant 0 : index
    %c0_34 = arith.constant 0 : index
    %78 = vector.load %arg6[%c0_33, %c0_34] : memref<1x128xf32, #tpu.memory_space<vmem>>, vector<1x128xf32>
    %79 = vector.broadcast %78 : vector<1x128xf32> to vector<64x128xf32>
    %80 = arith.addf %77, %79 : vector<64x128xf32>
    %c0_35 = arith.constant 0 : index
    %c0_36 = arith.constant 0 : index
    %81 = vector.load %arg7[%c0_35, %c0_36] : memref<64x128xf32, #tpu.memory_space<vmem>>, vector<64x128xf32>
    tpu.vector_store %arg7[%c0_35, %c0_36], %80 {strides = array<i32>} : memref<64x128xf32, #tpu.memory_space<vmem>>, vector<64x128xf32>,
    return
  }
  func.func @transform_0(%arg0: i32) -> (i32, i32) {
    %c0_i32 = arith.constant 0 : i32
    %c0_i32_0 = arith.constant 0 : i32
    return %arg0, %c0_i32 : i32, i32
  }
  func.func @transform_1(%arg0: i32) -> (i32, i32) {
    %c0_i32 = arith.constant 0 : i32
    %c0_i32_0 = arith.constant 0 : i32
    %c0_i32_1 = arith.constant 0 : i32
    return %c0_i32, %c0_i32_0 : i32, i32
  }
  func.func @transform_2(%arg0: i32) -> (i32, i32, i32) {
    %c0_i32 = arith.constant 0 : i32
    %c0_i32_0 = arith.constant 0 : i32
    %c0_i32_1 = arith.constant 0 : i32
    %c0_i32_2 = arith.constant 0 : i32
    return %c0_i32, %c0_i32_0, %c0_i32_1 : i32, i32, i32
  }
  func.func @transform_3(%arg0: i32) -> (i32, i32) {
    %c0_i32 = arith.constant 0 : i32
    %c0_i32_0 = arith.constant 0 : i32
    %c0_i32_1 = arith.constant 0 : i32
    return %c0_i32, %c0_i32_0 : i32, i32
  }
  func.func @transform_4(%arg0: i32) -> (i32, i32) {
    %c0_i32 = arith.constant 0 : i32
    %c0_i32_0 = arith.constant 0 : i32
    %c0_i32_1 = arith.constant 0 : i32
    return %c0_i32, %c0_i32_0 : i32, i32
  }
  func.func @transform_5(%arg0: i32) -> (i32, i32) {
    %c0_i32 = arith.constant 0 : i32
    %c0_i32_0 = arith.constant 0 : i32
    %c0_i32_1 = arith.constant 0 : i32
    return %c0_i32, %c0_i32_0 : i32, i32
  }
  func.func @transform_6(%arg0: i32) -> (i32, i32) {
    %c0_i32 = arith.constant 0 : i32
    %c0_i32_0 = arith.constant 0 : i32
    return %arg0, %c0_i32 : i32, i32
  }
}

</mosaic_0001>

<bundles_post_ra>
// kernel: tpu_custom_call.1
= control target key start
LH: loop header
LB: loop body
LE: loop exit
PB: predicated region body
PF: predicated region fallthrough
CT: control target
= control target key end

     0   :  { %11 = vsyncpa [#allocation3], 0  ;;  %s1301_s0 = inlined_call_operand.vmem [shape: f32[64,16], index: 0, kind: input, shape index: {}]   ;;  %s1302_s1 = inlined_call_operand.vmem [shape: f32[16,32], index: 1, kind: input, shape index: {}]   ;;  %s1303_s2 = inlined_call_operand.vmem [shape: f32[1,32,32], index: 2, kind: input, shape index: {}]   ;;  %s1304_s3 = inlined_call_operand.vmem [shape: f32[32,128], index: 3, kind: input, shape index: {}]   ;;  %s1305_s4 = inlined_call_operand.hbm [shape: f32[6,32], index: 4, kind: input, shape index: {}]   ;;  %s1306_s5 = inlined_call_operand.vmem [shape: f32[1,128], index: 5, kind: input, shape index: {}]   ;;  %s1307_s6 = inlined_call_operand.hbm [shape: f32[64,128], index: 6, kind: output, shape index: {}]  }
   0x1   :  { %12 = vsyncpa [#allocation4], 0  ;;  %s1063_s21 = smov [#allocation2]  }
   0x2   :  { %s27_s22 = sshll.u32 %s1063_s21, 4  ;;  %s28_s22 = int_to_ptr.vmem [resolvable:$true] %s27_s22 }
   0x3   :  { %s1027_s23 = scalar_lea.vmem %s28_s22, 128  ;;  %p1032_p1 = scmp.lt.s32.totalorder %s28_s22, %s28_s22 }
   0x4   :  { %p1028_p0 = scmp.ne.s32.totalorder %s28_s22, %s1027_s23  ;;  %p1033_p2 = scmp.lt.s32.totalorder %s1027_s23, %s1027_s23 }
   0x6   :  { %p1034_p3 = por %p1033_p2, %p1032_p1 }
   0x8   :  { %p1035_p4 = pnand %p1034_p3, %p1028_p0 }
   0xa   :  { %1038 = shalt.err (!%p1035_p4)
}
   0xb   :  { %30 = dma.hbm_to_vmem [thread:$0]  %s1305_s4, 128, %s28_s22, [#allocation3]  }
   0xc   :  { %1059 = dma.done.wait [#allocation3], 128  }
   0xd   :  { %1060 = vsyncadd [#allocation3], 4294967168  ;;  %v45_v0 = vld [vmem:[%s1302_s1 + $0x8] sm:$0xff]  ;;  %v44_v1 = vld [vmem:[%s1302_s1] sm:$0xff]  ;;  %vm51_vm0 = vcmask 130048   ;;  %vm223_vm1 = vcmask 261120  }
   0xe   :  { %891 = vmatprep.subr.mxu0 %v45_v0  ;;  %947 = vmatprep.subr.mxu1 %v45_v0  ;;  %v36_v2 = vld [vmem:[%s1301_s0] sm:$0xff]  ;;  %v37_v4 = vld [vmem:[%s1301_s0 + $0x8] sm:$0xff]  ;;  %v38_v6 = vld [vmem:[%s1301_s0 + $0x10] sm:$0xff]  ;;  %s1064_s10 = smov [#allocation5]  }
   0xf   :  { %892 = vmatpush3.msra.mxu0 %v45_v0  ;;  %949 = vmatpush3.msra.mxu1 %v45_v0  ;;  %v40_v3 = vld [vmem:[%s1301_s0 + $0x20] sm:$0xff]  ;;  %v41_v5 = vld [vmem:[%s1301_s0 + $0x28] sm:$0xff]  ;;  %v42_v7 = vld [vmem:[%s1301_s0 + $0x30] sm:$0xff] }
  0x10   :  { %893 = vmatprep.subr.mxu0 %v44_v1  ;;  %948 = vmatprep.subr.mxu1 %v44_v1  ;;  %v39_v8 = vld [vmem:[%s1301_s0 + $0x18] sm:$0xff]  ;;  %v826_v10 = vld [vmem:[#allocation2] ss:$0 sm:$0xff] }
  0x11   :  { %894 = vmatpush3.msra.mxu0 %v44_v1  ;;  %950 = vmatpush3.msra.mxu1 %v44_v1  ;;  %v43_v9 = vld [vmem:[%s1301_s0 + $0x38] sm:$0xff] }
  0x12   :  { %895 = vmatprep.mubr.msk.f32.mxu0 %vm51_vm0, %v36_v2  ;;  %901 = vmatprep.mubr.msk.f32.mxu1 %vm51_vm0, %v40_v3 }
  0x13   :  { %896 = vmatmul.mubr.msk.f32.vlgmr.msra.gmra.mxu0 %vm51_vm0, %v37_v4  ;;  %902 = vmatmul.mubr.msk.f32.vlgmr.msra.gmra.mxu1 %vm51_vm0, %v41_v5 }
  0x14   :  { %898 = vmatprep.mubr.msk.f32.mxu0 %vm51_vm0, %v38_v6  ;;  %904 = vmatprep.mubr.msk.f32.mxu1 %vm51_vm0, %v42_v7 }
  0x17   :  { %899 = vmatmul.mubr.msk.f32.gmra.mxu0 %vm51_vm0, %v39_v8  ;;  %905 = vmatmul.mubr.msk.f32.gmra.mxu1 %vm51_vm0, %v43_v9 }
  0xd3   :  { %v897_v11 = vpop.f32.mrf.mxu0  ;;  %v903_v12 = vpop.f32.mrf.mxu1 }
  0xd4   :  { %v148_v13 = vadd.f32 %v897_v11, %v826_v10  ;;  %v168_v21 = vadd.f32 %v903_v12, %v826_v10 }
  0xd5   :  { %v142_v14 = vpop.f32.mrf.mxu0  ;;  %v162_v15 = vpop.f32.mrf.mxu1 }
  0xd6   :  { %v190_v16 = vmul.f32 0.70710677, %v148_v13  ;;  %v143_v17 = vadd.f32 %v826_v10, %v142_v14  ;;  %v163_v18 = vadd.f32 %v826_v10, %v162_v15  ;;  %v194_v30 = vmul.f32 0.70710677, %v168_v21 }
  0xd7   :  { %v900_v19 = vpop.f32.mrf.mxu0  ;;  %v906_v20 = vpop.f32.mrf.mxu1  ;;  %v182_v42 = vmul.f32 0.5, %v148_v13  ;;  %v186_v63 = vmul.f32 0.5, %v168_v21 }
  0xd8   :  { %955 = verf.f32 %v190_v16  ;;  %v158_v22 = vadd.f32 %v900_v19, %v826_v10  ;;  %v189_v23 = vmul.f32 0.70710677, %v143_v17  ;;  %v193_v26 = vmul.f32 0.70710677, %v163_v18 }
  0xd9   :  { %v152_v24 = vpop.f32.mrf.mxu0  ;;  %v172_v25 = vpop.f32.mrf.mxu1  ;;  %v178_v31 = vadd.f32 %v906_v20, %v826_v10  ;;  %v181_v39 = vmul.f32 0.5, %v143_v17  ;;  %v185_v53 = vmul.f32 0.5, %v163_v18 }
  0xda   :  { %v192_v27 = vmul.f32 0.70710677, %v158_v22  ;;  %957 = verf.f32 %v189_v23  ;;  %v153_v28 = vadd.f32 %v826_v10, %v152_v24  ;;  %v173_v29 = vadd.f32 %v826_v10, %v172_v25 }
  0xdb   :  { %959 = verf.f32 %v193_v26  ;;  %v196_v34 = vmul.f32 0.70710677, %v178_v31  ;;  %v184_v54 = vmul.f32 0.5, %v158_v22  ;;  %v188_v6 = vmul.f32 0.5, %v178_v31 }
  0xdc   :  { %961 = verf.f32 %v192_v27  ;;  %v191_v32 = vmul.f32 0.70710677, %v153_v28  ;;  %v195_v33 = vmul.f32 0.70710677, %v173_v29  ;;  %v183_v45 = vmul.f32 0.5, %v153_v28 }
  0xdd   :  { %v187_v0 = vmul.f32 0.5, %v173_v29 }
  0xde   :  { %963 = verf.f32 %v191_v32 }
  0xdf   :  { %965 = verf.f32 %v194_v30 }
  0xe0   :  { %967 = verf.f32 %v195_v33 }
  0xe1   :  { %969 = verf.f32 %v196_v34 }
  0xe5   :  { %v956_v35 = vpop.eup %955 }
  0xe6   :  { %v206_v37 = vadd.f32 1.0, %v956_v35 }
  0xe7   :  { %v958_v36 = vpop.eup %957 }
  0xe8   :  { %v960_v38 = vpop.eup %959  ;;  %v205_v40 = vadd.f32 1.0, %v958_v36  ;;  %v214_v46 = vmul.f32 %v206_v37, %v182_v42 }
  0xe9   :  { %v962_v41 = vpop.eup %961  ;;  %v209_v51 = vadd.f32 1.0, %v960_v38 }
  0xea   :  { %v213_v43 = vmul.f32 %v205_v40, %v181_v39  ;;  %v208_v50 = vadd.f32 1.0, %v962_v41  ;;  %v227_v56 = vsel %vm223_vm1, %v214_v46, 0.0 }
  0xeb   :  { %v964_v44 = vpop.eup %963  ;;  %v217_v60 = vmul.f32 %v209_v51, %v185_v53  ;;  %v356_v51 = vld [vmem:[%s1303_s2 + $0x18] sm:$0xff]  ;;  %v354_v53 = vld [vmem:[%s1303_s2 + $0x8] sm:$0xff] }
  0xec   :  { %v966_v47 = vpop.eup %965  ;;  %v224_v48 = vsel %vm223_vm1, %v213_v43, 0.0  ;;  %v207_v49 = vadd.f32 1.0, %v964_v44  ;;  %v216_v59 = vmul.f32 %v208_v50, %v184_v54  ;;  %907 = vmatprep.subr.mxu1 %v356_v51  ;;  %v353_v54 = vld [vmem:[%s1303_s2] sm:$0xff] }
  0xed   :  { %v968_v52 = vpop.eup %967  ;;  %225 = vadd.xlane.f32.xlu0 %v224_v48  ;;  %v210_v57 = vadd.f32 1.0, %v966_v47  ;;  %v236_v3 = vsel %vm223_vm1, %v217_v60, 0.0  ;;  %908 = vmatpush3.msra.mxu1 %v356_v51 }
  0xee   :  { %v215_v55 = vmul.f32 %v207_v49, %v183_v45  ;;  %v211_v61 = vadd.f32 1.0, %v968_v52  ;;  %v970_v62 = vpop.eup %969  ;;  %v233_v2 = vsel %vm223_vm1, %v216_v59, 0.0  ;;  %v355_v52 = vld [vmem:[%s1303_s2 + $0x10] sm:$0xff] }
  0xef   :  { %v218_v1 = vmul.f32 %v210_v57, %v186_v63  ;;  %v212_v5 = vadd.f32 1.0, %v970_v62  ;;  %909 = vmatprep.subr.mxu1 %v355_v52 }
  0xf0   :  { %v230_v58 = vsel %vm223_vm1, %v215_v55, 0.0  ;;  %v219_v4 = vmul.f32 %v211_v61, %v187_v0  ;;  %910 = vmatpush3.msra.mxu1 %v355_v52 }
  0xf1   :  { %231 = vadd.xlane.f32.xlu1 %v230_v58  ;;  %228 = vadd.xlane.f32.xlu0 %v227_v56  ;;  %v239_v7 = vsel %vm223_vm1, %v218_v1, 0.0  ;;  %v220_v9 = vmul.f32 %v212_v5, %v188_v6 }
  0xf2   :  { %v242_v8 = vsel %vm223_vm1, %v219_v4, 0.0  ;;  %911 = vmatprep.subr.mxu1 %v354_v53 }
  0xf3   :  { %v245_v10 = vsel %vm223_vm1, %v220_v9, 0.0  ;;  %912 = vmatpush3.msra.mxu1 %v354_v53 }
  0xf4   :  { %913 = vmatprep.subr.mxu1 %v353_v54 }
  0xf5   :  { %234 = vadd.xlane.f32.xlu1 %v233_v2  ;;  %237 = vadd.xlane.f32.xlu0 %v236_v3 }
  0xf6   :  { %914 = vmatpush3.msra.mxu1 %v353_v54 }
  0xf9   :  { %240 = vadd.xlane.f32.xlu1 %v239_v7  ;;  %243 = vadd.xlane.f32.xlu0 %v242_v8 }
  0xfd   :  { %246 = vadd.xlane.f32.xlu1 %v245_v10 }
 0x176   :  { %v226_v11 = vpop.xlane.xlu0 %225 }
 0x177   :  { %v249_v12 = vmul.f32 0.03125, %v226_v11 }
 0x179   :  { %v1151_v13 = vsub.f32 %v213_v43, %v249_v12 }
 0x17a   :  { %v232_v14 = vpop.xlane.xlu1 %231  ;;  %v229_v15 = vpop.xlane.xlu0 %228 }
 0x17b   :  { %v251_v16 = vmul.f32 0.03125, %v232_v14  ;;  %v250_v17 = vmul.f32 0.03125, %v229_v15  ;;  %v265_v18 = vmul.f32 %v1151_v13, %v1151_v13 }
 0x17d   :  { %v1155_v19 = vsub.f32 %v215_v55, %v251_v16  ;;  %v1157_v20 = vsub.f32 %v214_v46, %v250_v17  ;;  %v273_v21 = vsel %vm223_vm1, %v265_v18, 0.0  ;;  %v835_v16 = vld [vmem:[#allocation2 + $0x2] ss:$0 sm:$0xff] }
 0x17e   :  { %v235_v22 = vpop.xlane.xlu1 %234  ;;  %274 = vadd.xlane.f32.xlu0 %v273_v21  ;;  %v238_v23 = vpop.xlane.xlu0 %237  ;;  %v836_v21 = vld [vmem:[#allocation2 + $0x4] ss:$0 sm:$0xff] }
 0x17f   :  { %v252_v24 = vmul.f32 0.03125, %v235_v22  ;;  %v253_v25 = vmul.f32 0.03125, %v238_v23  ;;  %v267_v26 = vmul.f32 %v1155_v19, %v1155_v19  ;;  %v266_v27 = vmul.f32 %v1157_v20, %v1157_v20 }
 0x181   :  { %v1164_v28 = vsub.f32 %v216_v59, %v252_v24  ;;  %v1166_v29 = vsub.f32 %v217_v60, %v253_v25  ;;  %v279_v30 = vsel %vm223_vm1, %v267_v26, 0.0  ;;  %v276_v31 = vsel %vm223_vm1, %v266_v27, 0.0 }
 0x182   :  { %v241_v32 = vpop.xlane.xlu1 %240  ;;  %280 = vadd.xlane.f32.xlu0 %v279_v30  ;;  %277 = vadd.xlane.f32.xlu1 %v276_v31  ;;  %v244_v33 = vpop.xlane.xlu0 %243 }
 0x183   :  { %v254_v34 = vmul.f32 0.03125, %v241_v32  ;;  %v255_v35 = vmul.f32 0.03125, %v244_v33  ;;  %v268_v36 = vmul.f32 %v1164_v28, %v1164_v28  ;;  %v269_v37 = vmul.f32 %v1166_v29, %v1166_v29 }
 0x185   :  { %v1174_v38 = vsub.f32 %v218_v1, %v254_v34  ;;  %v1176_v39 = vsub.f32 %v219_v4, %v255_v35  ;;  %v282_v40 = vsel %vm223_vm1, %v268_v36, 0.0  ;;  %v285_v41 = vsel %vm223_vm1, %v269_v37, 0.0 }
 0x186   :  { %v247_v42 = vpop.xlane.xlu1 %246  ;;  %283 = vadd.xlane.f32.xlu1 %v282_v40  ;;  %286 = vadd.xlane.f32.xlu0 %v285_v41 }
 0x187   :  { %v256_v43 = vmul.f32 0.03125, %v247_v42  ;;  %v270_v44 = vmul.f32 %v1174_v38, %v1174_v38  ;;  %v271_v45 = vmul.f32 %v1176_v39, %v1176_v39 }
 0x189   :  { %v1184_v46 = vsub.f32 %v220_v9, %v256_v43  ;;  %v288_v47 = vsel %vm223_vm1, %v270_v44, 0.0  ;;  %v291_v48 = vsel %vm223_vm1, %v271_v45, 0.0 }
 0x18a   :  { %289 = vadd.xlane.f32.xlu1 %v288_v47  ;;  %292 = vadd.xlane.f32.xlu0 %v291_v48 }
 0x18b   :  { %v272_v49 = vmul.f32 %v1184_v46, %v1184_v46 }
 0x18d   :  { %v294_v50 = vsel %vm223_vm1, %v272_v49, 0.0 }
 0x18e   :  { %295 = vadd.xlane.f32.xlu1 %v294_v50 }
 0x207   :  { %v275_v55 = vpop.xlane.xlu0 %274 }
 0x208   :  { %v297_v56 = vmul.f32 0.03125, %v275_v55 }
 0x20a   :  { %v305_v57 = vadd.f32 1e-05, %v297_v56 }
 0x20b   :  { %v278_v58 = vpop.xlane.xlu1 %277  ;;  %v281_v59 = vpop.xlane.xlu0 %280 }
 0x20c   :  { %971 = vrsqrt.f32 %v305_v57  ;;  %v298_v60 = vmul.f32 0.03125, %v278_v58  ;;  %v299_v61 = vmul.f32 0.03125, %v281_v59 }
 0x20e   :  { %v306_v62 = vadd.f32 1e-05, %v298_v60  ;;  %v307_v63 = vadd.f32 1e-05, %v299_v61 }
 0x20f   :  { %v284_v0 = vpop.xlane.xlu1 %283  ;;  %v287_v1 = vpop.xlane.xlu0 %286 }
 0x210   :  { %973 = vrsqrt.f32 %v306_v62  ;;  %v300_v2 = vmul.f32 0.03125, %v284_v0  ;;  %v301_v3 = vmul.f32 0.03125, %v287_v1 }
 0x211   :  { %975 = vrsqrt.f32 %v307_v63 }
 0x212   :  { %v308_v4 = vadd.f32 1e-05, %v300_v2  ;;  %v309_v5 = vadd.f32 1e-05, %v301_v3 }
 0x213   :  { %v290_v6 = vpop.xlane.xlu1 %289  ;;  %v293_v7 = vpop.xlane.xlu0 %292 }
 0x214   :  { %977 = vrsqrt.f32 %v308_v4  ;;  %v302_v8 = vmul.f32 0.03125, %v290_v6  ;;  %v303_v9 = vmul.f32 0.03125, %v293_v7 }
 0x215   :  { %979 = vrsqrt.f32 %v309_v5 }
 0x216   :  { %v310_v10 = vadd.f32 1e-05, %v302_v8  ;;  %v311_v11 = vadd.f32 1e-05, %v303_v9 }
 0x217   :  { %v296_v12 = vpop.xlane.xlu1 %295 }
 0x218   :  { %981 = vrsqrt.f32 %v310_v10  ;;  %v304_v14 = vmul.f32 0.03125, %v296_v12 }
 0x219   :  { %v972_v15 = vpop.eup %971  ;;  %983 = vrsqrt.f32 %v311_v11 }
 0x21a   :  { %v312_v17 = vadd.f32 1e-05, %v304_v14  ;;  %v321_v18 = vmul.f32 %v972_v15, %v1151_v13 }
 0x21c   :  { %985 = vrsqrt.f32 %v312_v17  ;;  %v333_v22 = vmul.f32 %v835_v16, %v321_v18 }
 0x21d   :  { %v974_v23 = vpop.eup %973 }
 0x21e   :  { %v976_v24 = vpop.eup %975  ;;  %v322_v25 = vmul.f32 %v974_v23, %v1157_v20  ;;  %v345_v26 = vadd.f32 %v836_v21, %v333_v22 }
 0x21f   :  { %v323_v27 = vmul.f32 %v976_v24, %v1155_v19 }
 0x220   :  { %v334_v30 = vmul.f32 %v835_v16, %v322_v25  ;;  %915 = vmatprep.mubr.msk.f32.mxu1 %vm223_vm1, %v345_v26 }
 0x221   :  { %v978_v31 = vpop.eup %977  ;;  %v335_v32 = vmul.f32 %v835_v16, %v323_v27 }
 0x222   :  { %v980_v33 = vpop.eup %979  ;;  %v346_v34 = vadd.f32 %v836_v21, %v334_v30  ;;  %v324_v35 = vmul.f32 %v978_v31, %v1164_v28 }
 0x223   :  { %v347_v13 = vadd.f32 %v836_v21, %v335_v32  ;;  %v325_v36 = vmul.f32 %v980_v33, %v1166_v29 }
 0x224   :  { %916 = vmatmul.mubr.msk.f32.vlgmr.msra.gmra.mxu1 %vm223_vm1, %v346_v34  ;;  %v336_v37 = vmul.f32 %v835_v16, %v324_v35 }
 0x225   :  { %v982_v40 = vpop.eup %981  ;;  %918 = vmatprep.mubr.msk.f32.mxu1 %vm223_vm1, %v347_v13  ;;  %v337_v20 = vmul.f32 %v835_v16, %v325_v36 }
 0x226   :  { %v984_v19 = vpop.eup %983  ;;  %v348_v41 = vadd.f32 %v836_v21, %v336_v37  ;;  %v326_v42 = vmul.f32 %v982_v40, %v1174_v38 }
 0x227   :  { %v349_v43 = vadd.f32 %v836_v21, %v337_v20  ;;  %v327_v44 = vmul.f32 %v984_v19, %v1176_v39  ;;  %v837_v39 = vld [vmem:[#allocation2 + $0x1] ss:$0 sm:$0xff] }
 0x228   :  { %919 = vmatmul.mubr.msk.f32.gmra.mxu1 %vm223_vm1, %v348_v41  ;;  %v338_v28 = vmul.f32 %v835_v16, %v326_v42 }
 0x229   :  { %v986_v45 = vpop.eup %985  ;;  %921 = vmatprep.mubr.msk.f32.mxu1 %vm223_vm1, %v349_v43  ;;  %v339_v29 = vmul.f32 %v835_v16, %v327_v44 }
 0x22a   :  { %v350_v47 = vadd.f32 %v836_v21, %v338_v28  ;;  %v328_v48 = vmul.f32 %v986_v45, %v1184_v46 }
 0x22b   :  { %v351_v49 = vadd.f32 %v836_v21, %v339_v29 }
 0x22c   :  { %922 = vmatmul.mubr.msk.f32.gmra.mxu1 %vm223_vm1, %v350_v47  ;;  %v340_v50 = vmul.f32 %v835_v16, %v328_v48 }
 0x22d   :  { %924 = vmatprep.mubr.msk.f32.mxu1 %vm223_vm1, %v351_v49 }
 0x22e   :  { %v352_v38 = vadd.f32 %v836_v21, %v340_v50 }
 0x230   :  { %925 = vmatmul.mubr.msk.f32.gmra.mxu1 %vm223_vm1, %v352_v38 }
 0x2e4   :  { %v917_v51 = vpop.f32.mrf.mxu1 }
 0x2e5   :  { %v458_v52 = vadd.f32 %v917_v51, %v837_v39 }
 0x2e6   :  { %v452_v53 = vpop.f32.mrf.mxu1 }
 0x2e7   :  { %v500_v54 = vmul.f32 0.70710677, %v458_v52  ;;  %v453_v55 = vadd.f32 %v837_v39, %v452_v53  ;;  %v492_v11 = vmul.f32 0.5, %v458_v52 }
 0x2e8   :  { %v920_v56 = vpop.f32.mrf.mxu1 }
 0x2e9   :  { %987 = verf.f32 %v500_v54  ;;  %v499_v57 = vmul.f32 0.70710677, %v453_v55  ;;  %v468_v58 = vadd.f32 %v920_v56, %v837_v39  ;;  %v491_v15 = vmul.f32 0.5, %v453_v55 }
 0x2ea   :  { %v462_v46 = vpop.f32.mrf.mxu1 }
 0x2eb   :  { %989 = verf.f32 %v499_v57  ;;  %v502_v59 = vmul.f32 0.70710677, %v468_v58  ;;  %v463_v60 = vadd.f32 %v837_v39, %v462_v46  ;;  %v494_v21 = vmul.f32 0.5, %v468_v58 }
 0x2ec   :  { %v923_v61 = vpop.f32.mrf.mxu1 }
 0x2ed   :  { %991 = verf.f32 %v502_v59  ;;  %v501_v62 = vmul.f32 0.70710677, %v463_v60  ;;  %v478_v63 = vadd.f32 %v923_v61, %v837_v39  ;;  %v493_v26 = vmul.f32 0.5, %v463_v60 }
 0x2ee   :  { %v472_v0 = vpop.f32.mrf.mxu1 }
 0x2ef   :  { %993 = verf.f32 %v501_v62  ;;  %v504_v1 = vmul.f32 0.70710677, %v478_v63  ;;  %v473_v2 = vadd.f32 %v837_v39, %v472_v0  ;;  %v496_v33 = vmul.f32 0.5, %v478_v63 }
 0x2f0   :  { %v926_v3 = vpop.f32.mrf.mxu1 }
 0x2f1   :  { %995 = verf.f32 %v504_v1  ;;  %v503_v4 = vmul.f32 0.70710677, %v473_v2  ;;  %v488_v5 = vadd.f32 %v926_v3, %v837_v39  ;;  %v495_v37 = vmul.f32 0.5, %v473_v2 }
 0x2f2   :  { %v482_v6 = vpop.f32.mrf.mxu1 }
 0x2f3   :  { %997 = verf.f32 %v503_v4  ;;  %v506_v7 = vmul.f32 0.70710677, %v488_v5  ;;  %v483_v8 = vadd.f32 %v837_v39, %v482_v6  ;;  %v498_v42 = vmul.f32 0.5, %v488_v5 }
 0x2f5   :  { %999 = verf.f32 %v506_v7  ;;  %v505_v9 = vmul.f32 0.70710677, %v483_v8  ;;  %v497_v29 = vmul.f32 0.5, %v483_v8 }
 0x2f6   :  { %v988_v10 = vpop.eup %987 }
 0x2f7   :  { %1001 = verf.f32 %v505_v9  ;;  %v516_v12 = vadd.f32 1.0, %v988_v10 }
 0x2f8   :  { %v990_v14 = vpop.eup %989 }
 0x2f9   :  { %v524_v16 = vmul.f32 %v516_v12, %v492_v11  ;;  %v515_v17 = vadd.f32 1.0, %v990_v14 }
 0x2fa   :  { %v992_v18 = vpop.eup %991 }
 0x2fb   :  { %v536_v22 = vsel %vm223_vm1, %v524_v16, 0.0  ;;  %v523_v23 = vmul.f32 %v515_v17, %v491_v15  ;;  %v518_v24 = vadd.f32 1.0, %v992_v18 }
 0x2fc   :  { %v994_v25 = vpop.eup %993  ;;  %537 = vadd.xlane.f32.xlu1 %v536_v22 }
 0x2fd   :  { %v533_v27 = vsel %vm223_vm1, %v523_v23, 0.0  ;;  %v526_v30 = vmul.f32 %v518_v24, %v494_v21  ;;  %v517_v31 = vadd.f32 1.0, %v994_v25 }
 0x2fe   :  { %v996_v32 = vpop.eup %995  ;;  %534 = vadd.xlane.f32.xlu0 %v533_v27 }
 0x2ff   :  { %v542_v34 = vsel %vm223_vm1, %v526_v30, 0.0  ;;  %v525_v35 = vmul.f32 %v517_v31, %v493_v26  ;;  %v520_v13 = vadd.f32 1.0, %v996_v32  ;;  %v664_v31 = vld [vmem:[%s1304_s3 + $0x18] sm:$0xff]  ;;  %v663_v32 = vld [vmem:[%s1304_s3 + $0x10] sm:$0xff] }
 0x300   :  { %v998_v36 = vpop.eup %997  ;;  %543 = vadd.xlane.f32.xlu1 %v542_v34  ;;  %927 = vmatprep.subr.mxu0 %v664_v31  ;;  %v661_v34 = vld [vmem:[%s1304_s3] sm:$0xff] }
 0x301   :  { %v539_v40 = vsel %vm223_vm1, %v525_v35, 0.0  ;;  %v528_v20 = vmul.f32 %v520_v13, %v496_v33  ;;  %v519_v19 = vadd.f32 1.0, %v998_v36  ;;  %928 = vmatpush3.msra.mxu0 %v664_v31  ;;  %v662_v33 = vld [vmem:[%s1304_s3 + $0x8] sm:$0xff] }
 0x302   :  { %v1000_v41 = vpop.eup %999  ;;  %540 = vadd.xlane.f32.xlu0 %v539_v40  ;;  %929 = vmatprep.subr.mxu0 %v663_v32 }
 0x303   :  { %v548_v43 = vsel %vm223_vm1, %v528_v20, 0.0  ;;  %v527_v44 = vmul.f32 %v519_v19, %v495_v37  ;;  %v522_v28 = vadd.f32 1.0, %v1000_v41  ;;  %930 = vmatpush3.msra.mxu0 %v663_v32 }
 0x304   :  { %v1002_v45 = vpop.eup %1001  ;;  %549 = vadd.xlane.f32.xlu1 %v548_v43  ;;  %931 = vmatprep.subr.mxu0 %v662_v33 }
 0x305   :  { %v545_v47 = vsel %vm223_vm1, %v527_v44, 0.0  ;;  %v530_v48 = vmul.f32 %v522_v28, %v498_v42  ;;  %v521_v49 = vadd.f32 1.0, %v1002_v45  ;;  %932 = vmatpush3.msra.mxu0 %v662_v33 }
 0x306   :  { %546 = vadd.xlane.f32.xlu0 %v545_v47  ;;  %933 = vmatprep.subr.mxu0 %v661_v34 }
 0x307   :  { %v554_v50 = vsel %vm223_vm1, %v530_v48, 0.0  ;;  %v529_v38 = vmul.f32 %v521_v49, %v497_v29  ;;  %934 = vmatpush3.msra.mxu0 %v661_v34 }
 0x308   :  { %555 = vadd.xlane.f32.xlu1 %v554_v50 }
 0x309   :  { %v551_v39 = vsel %vm223_vm1, %v529_v38, 0.0 }
 0x30a   :  { %552 = vadd.xlane.f32.xlu0 %v551_v39 }
 0x385   :  { %v538_v51 = vpop.xlane.xlu1 %537 }
 0x386   :  { %v558_v52 = vmul.f32 0.03125, %v538_v51 }
 0x387   :  { %v535_v53 = vpop.xlane.xlu0 %534 }
 0x388   :  { %v1227_v54 = vsub.f32 %v524_v16, %v558_v52  ;;  %v557_v55 = vmul.f32 0.03125, %v535_v53 }
 0x389   :  { %v544_v56 = vpop.xlane.xlu1 %543 }
 0x38a   :  { %v1229_v57 = vsub.f32 %v523_v23, %v557_v55  ;;  %v560_v58 = vmul.f32 0.03125, %v544_v56  ;;  %v574_v46 = vmul.f32 %v1227_v54, %v1227_v54 }
 0x38b   :  { %v541_v59 = vpop.xlane.xlu0 %540 }
 0x38c   :  { %v1233_v60 = vsub.f32 %v526_v30, %v560_v58  ;;  %v559_v61 = vmul.f32 0.03125, %v541_v59  ;;  %v584_v62 = vsel %vm223_vm1, %v574_v46, 0.0  ;;  %v573_v63 = vmul.f32 %v1229_v57, %v1229_v57  ;;  %v846_v58 = vld [vmem:[#allocation2 + $0x3] ss:$0 sm:$0xff] }
 0x38d   :  { %v550_v0 = vpop.xlane.xlu1 %549  ;;  %585 = vadd.xlane.f32.xlu1 %v584_v62 }
 0x38e   :  { %v1238_v1 = vsub.f32 %v525_v35, %v559_v61  ;;  %v562_v2 = vmul.f32 0.03125, %v550_v0  ;;  %v581_v3 = vsel %vm223_vm1, %v573_v63, 0.0  ;;  %v576_v4 = vmul.f32 %v1233_v60, %v1233_v60  ;;  %v847_v0 = vld [vmem:[#allocation2 + $0x5] ss:$0 sm:$0xff] }
 0x38f   :  { %582 = vadd.xlane.f32.xlu0 %v581_v3  ;;  %v547_v5 = vpop.xlane.xlu0 %546 }
 0x390   :  { %v1243_v6 = vsub.f32 %v528_v20, %v562_v2  ;;  %v561_v7 = vmul.f32 0.03125, %v547_v5  ;;  %v590_v8 = vsel %vm223_vm1, %v576_v4, 0.0  ;;  %v575_v9 = vmul.f32 %v1238_v1, %v1238_v1 }
 0x391   :  { %591 = vadd.xlane.f32.xlu1 %v590_v8  ;;  %v556_v10 = vpop.xlane.xlu1 %555 }
 0x392   :  { %v1248_v11 = vsub.f32 %v527_v44, %v561_v7  ;;  %v564_v12 = vmul.f32 0.03125, %v556_v10  ;;  %v587_v14 = vsel %vm223_vm1, %v575_v9, 0.0  ;;  %v578_v15 = vmul.f32 %v1243_v6, %v1243_v6 }
 0x393   :  { %588 = vadd.xlane.f32.xlu0 %v587_v14  ;;  %v553_v16 = vpop.xlane.xlu0 %552 }
 0x394   :  { %v1253_v17 = vsub.f32 %v530_v48, %v564_v12  ;;  %v563_v18 = vmul.f32 0.03125, %v553_v16  ;;  %v596_v21 = vsel %vm223_vm1, %v578_v15, 0.0  ;;  %v577_v22 = vmul.f32 %v1248_v11, %v1248_v11 }
 0x395   :  { %597 = vadd.xlane.f32.xlu1 %v596_v21 }
 0x396   :  { %v1258_v23 = vsub.f32 %v529_v38, %v563_v18  ;;  %v593_v24 = vsel %vm223_vm1, %v577_v22, 0.0  ;;  %v580_v25 = vmul.f32 %v1253_v17, %v1253_v17 }
 0x397   :  { %594 = vadd.xlane.f32.xlu0 %v593_v24 }
 0x398   :  { %v602_v26 = vsel %vm223_vm1, %v580_v25, 0.0  ;;  %v579_v27 = vmul.f32 %v1258_v23, %v1258_v23 }
 0x399   :  { %603 = vadd.xlane.f32.xlu1 %v602_v26 }
 0x39a   :  { %v599_v30 = vsel %vm223_vm1, %v579_v27, 0.0 }
 0x39b   :  { %600 = vadd.xlane.f32.xlu0 %v599_v30 }
 0x416   :  { %v586_v35 = vpop.xlane.xlu1 %585 }
 0x417   :  { %v606_v13 = vmul.f32 0.03125, %v586_v35 }
 0x418   :  { %v583_v36 = vpop.xlane.xlu0 %582 }
 0x419   :  { %v614_v37 = vadd.f32 1e-05, %v606_v13  ;;  %v605_v40 = vmul.f32 0.03125, %v583_v36 }
 0x41a   :  { %v592_v20 = vpop.xlane.xlu1 %591 }
 0x41b   :  { %1003 = vrsqrt.f32 %v614_v37  ;;  %v613_v19 = vadd.f32 1e-05, %v605_v40  ;;  %v608_v41 = vmul.f32 0.03125, %v592_v20 }
 0x41c   :  { %v589_v42 = vpop.xlane.xlu0 %588 }
 0x41d   :  { %1005 = vrsqrt.f32 %v613_v19  ;;  %v616_v43 = vadd.f32 1e-05, %v608_v41  ;;  %v607_v44 = vmul.f32 0.03125, %v589_v42 }
 0x41e   :  { %v598_v28 = vpop.xlane.xlu1 %597 }
 0x41f   :  { %1007 = vrsqrt.f32 %v616_v43  ;;  %v615_v45 = vadd.f32 1e-05, %v607_v44  ;;  %v610_v29 = vmul.f32 0.03125, %v598_v28 }
 0x420   :  { %v595_v47 = vpop.xlane.xlu0 %594 }
 0x421   :  { %1009 = vrsqrt.f32 %v615_v45  ;;  %v618_v48 = vadd.f32 1e-05, %v610_v29  ;;  %v609_v49 = vmul.f32 0.03125, %v595_v47 }
 0x422   :  { %v604_v50 = vpop.xlane.xlu1 %603 }
 0x423   :  { %1011 = vrsqrt.f32 %v618_v48  ;;  %v617_v38 = vadd.f32 1e-05, %v609_v49  ;;  %v612_v39 = vmul.f32 0.03125, %v604_v50 }
 0x424   :  { %v601_v51 = vpop.xlane.xlu0 %600 }
 0x425   :  { %1013 = vrsqrt.f32 %v617_v38  ;;  %v620_v52 = vadd.f32 1e-05, %v612_v39  ;;  %v611_v53 = vmul.f32 0.03125, %v601_v51 }
 0x427   :  { %1015 = vrsqrt.f32 %v620_v52  ;;  %v619_v55 = vadd.f32 1e-05, %v611_v53 }
 0x428   :  { %v1004_v56 = vpop.eup %1003 }
 0x429   :  { %v630_v46 = vmul.f32 %v1004_v56, %v1227_v54  ;;  %1017 = vrsqrt.f32 %v619_v55 }
 0x42a   :  { %v1006_v59 = vpop.eup %1005 }
 0x42b   :  { %v629_v61 = vmul.f32 %v1006_v59, %v1229_v57  ;;  %v642_v63 = vmul.f32 %v846_v58, %v630_v46 }
 0x42c   :  { %v1008_v62 = vpop.eup %1007 }
 0x42d   :  { %v641_v2 = vmul.f32 %v846_v58, %v629_v61  ;;  %v632_v3 = vmul.f32 %v1008_v62, %v1233_v60  ;;  %v654_v9 = vadd.f32 %v847_v0, %v642_v63 }
 0x42e   :  { %v1010_v4 = vpop.eup %1009 }
 0x42f   :  { %v653_v5 = vadd.f32 %v847_v0, %v641_v2  ;;  %v631_v7 = vmul.f32 %v1010_v4, %v1238_v1  ;;  %v644_v10 = vmul.f32 %v846_v58, %v632_v3 }
 0x430   :  { %v1012_v8 = vpop.eup %1011 }
 0x431   :  { %935 = vmatprep.mubr.msk.f32.mxu0 %vm223_vm1, %v653_v5  ;;  %v643_v54 = vmul.f32 %v846_v58, %v631_v7  ;;  %v634_v12 = vmul.f32 %v1012_v8, %v1243_v6  ;;  %v656_v60 = vadd.f32 %v847_v0, %v644_v10 }
 0x432   :  { %v1014_v14 = vpop.eup %1013  ;;  %936 = vmatmul.mubr.msk.f32.vlgmr.msra.gmra.mxu0 %vm223_vm1, %v654_v9 }
 0x433   :  { %v655_v57 = vadd.f32 %v847_v0, %v643_v54  ;;  %v633_v15 = vmul.f32 %v1014_v14, %v1248_v11  ;;  %v646_v18 = vmul.f32 %v846_v58, %v634_v12 }
 0x434   :  { %v1016_v16 = vpop.eup %1015 }
 0x435   :  { %938 = vmatprep.mubr.msk.f32.mxu0 %vm223_vm1, %v655_v57  ;;  %v645_v1 = vmul.f32 %v846_v58, %v633_v15  ;;  %v636_v21 = vmul.f32 %v1016_v16, %v1253_v17  ;;  %v658_v25 = vadd.f32 %v847_v0, %v646_v18  ;;  %v848_v17 = vld [vmem:[%s1306_s5] ss:$0 sm:$0xff]  ;;  %s814_s5 = sshll.u32 %s1064_s10, 4  ;;  %s815_s5 = int_to_ptr.vmem [resolvable:$true] %s814_s5 }
 0x436   :  { %v1018_v22 = vpop.eup %1017  ;;  %939 = vmatmul.mubr.msk.f32.gmra.mxu0 %vm223_vm1, %v656_v60  ;;  %s1039_s1 = scalar_lea.vmem %s815_s5, 1024  ;;  %p1044_p6 = scmp.lt.s32.totalorder %s815_s5, %s815_s5 }
 0x437   :  { %v657_v24 = vadd.f32 %v847_v0, %v645_v1  ;;  %v635_v6 = vmul.f32 %v1018_v22, %v1258_v23  ;;  %v648_v26 = vmul.f32 %v846_v58, %v636_v21  ;;  %p1040_p5 = scmp.ne.s32.totalorder %s815_s5, %s1039_s1  ;;  %p1045_p7 = scmp.lt.s32.totalorder %s1039_s1, %s1039_s1 }
 0x439   :  { %941 = vmatprep.mubr.msk.f32.mxu0 %vm223_vm1, %v657_v24  ;;  %v647_v27 = vmul.f32 %v846_v58, %v635_v6  ;;  %v660_v30 = vadd.f32 %v847_v0, %v648_v26  ;;  %p1046_p8 = por %p1045_p7, %p1044_p6 }
 0x43a   :  { %942 = vmatmul.mubr.msk.f32.gmra.mxu0 %vm223_vm1, %v658_v25 }
 0x43b   :  { %v659_v11 = vadd.f32 %v847_v0, %v647_v27  ;;  %p1047_p9 = pnand %p1046_p8, %p1040_p5 }
 0x43d   :  { %944 = vmatprep.mubr.msk.f32.mxu0 %vm223_vm1, %v659_v11 }
 0x43e   :  { %945 = vmatmul.mubr.msk.f32.gmra.mxu0 %vm223_vm1, %v660_v30 }
 0x4f2   :  { %v937_v31 = vpop.f32.mrf.mxu0 }
 0x4f3   :  { %v768_v32 = vadd.f32 %v937_v31, %v848_v17 }
 0x4f4   :  { %v762_v23 = vpop.f32.mrf.mxu0 }
 0x4f5   :  { %802 = vst [vmem:[#allocation5 + $0x8] sm:$0xff] %v768_v32  ;;  %v763_v33 = vadd.f32 %v848_v17, %v762_v23 }
 0x4f6   :  { %v940_v34 = vpop.f32.mrf.mxu0 }
 0x4f7   :  { %801 = vst [vmem:[#allocation5] sm:$0xff] %v763_v33  ;;  %v778_v35 = vadd.f32 %v940_v34, %v848_v17 }
 0x4f8   :  { %v772_v13 = vpop.f32.mrf.mxu0 }
 0x4f9   :  { %804 = vst [vmem:[#allocation5 + $0x18] sm:$0xff] %v778_v35  ;;  %v773_v36 = vadd.f32 %v848_v17, %v772_v13 }
 0x4fa   :  { %v943_v37 = vpop.f32.mrf.mxu0 }
 0x4fb   :  { %803 = vst [vmem:[#allocation5 + $0x10] sm:$0xff] %v773_v36  ;;  %v788_v40 = vadd.f32 %v943_v37, %v848_v17 }
 0x4fc   :  { %v782_v20 = vpop.f32.mrf.mxu0 }
 0x4fd   :  { %806 = vst [vmem:[#allocation5 + $0x28] sm:$0xff] %v788_v40  ;;  %v783_v19 = vadd.f32 %v848_v17, %v782_v20 }
 0x4fe   :  { %v946_v41 = vpop.f32.mrf.mxu0 }
 0x4ff   :  { %805 = vst [vmem:[#allocation5 + $0x20] sm:$0xff] %v783_v19  ;;  %v798_v42 = vadd.f32 %v946_v41, %v848_v17 }
 0x500   :  { %v792_v43 = vpop.f32.mrf.mxu0 }
 0x501   :  { %808 = vst [vmem:[#allocation5 + $0x38] sm:$0xff] %v798_v42  ;;  %v793_v44 = vadd.f32 %v848_v17, %v792_v43 }
 0x503   :  { %807 = vst [vmem:[#allocation5 + $0x30] sm:$0xff] %v793_v44 }
 0x504   :  { %1050 = shalt.err (!%p1047_p9)
}
 0x505   :  { %s1065_s11 = smov 128   ;;  %s1066_s12 = smov 8  }
 0x506   :  { %820 = dma.vmem_to_hbm [thread:$0]  %s815_s5, 1024, %s1307_s6, [#allocation4], %s1065_s11, %s1065_s11, %s1066_s12  }
 0x507   :  { %1061 = dma.done.wait [#allocation4], 1024  }
 0x508   :  { %1062 = vsyncadd [#allocation4], 4294966272 }
 0x509   :  { %824 = vsyncpa [#allocation3], 1 }
 0x50a   :  { %825 = vsyncpa [#allocation4], 1 }

</bundles_post_ra>
